<compile_context>
chip_gen: v7x
topology: tpu7x:2x2x1
jax: 0.10.0
libtpu: 0.0.40
codegen_flags: <defaults>
</compile_context>

<pallas_src>
import functools

import jax
import jax.numpy as jnp
import numpy as np
from jax.experimental import pallas as pl
from jax.experimental.pallas import tpu as pltpu


def _round_up(x: int, m: int) -> int:
    return (x + m - 1) // m * m


# ---------------------------------------------------------------------------
# Shared math (used both inside the kernel and by the pure-JAX reference)
# ---------------------------------------------------------------------------
def _sample_geometry(key, in_hw, target_size, scale_range):
    """Sample jitter scale; derive resized size and crop(+)/pad(-) offsets.

    Scalar-only ops (negligible). Returns int32[4] = [new_h, new_w, crop_h, crop_w].
    """
    H, W = in_hw
    Th, Tw = target_size
    u = jax.random.uniform(key, (), dtype=jnp.float32)
    scale = jnp.float32(scale_range[0]) + u * jnp.float32(scale_range[1] - scale_range[0])
    r = jnp.float32(min(Tw / W, Th / H)) * scale
    new_h = jnp.maximum(jnp.floor(H * r).astype(jnp.int32), 1)
    new_w = jnp.maximum(jnp.floor(W * r).astype(jnp.int32), 1)
    crop_h = jnp.where(new_h >= Th, (new_h - Th) // 2, -((Th - new_h) // 2))
    crop_w = jnp.where(new_w >= Tw, (new_w - Tw) // 2, -((Tw - new_w) // 2))
    return jnp.stack([new_h, new_w, crop_h, crop_w]).astype(jnp.int32)


def _weight_block(new_len, crop, in_len, tgt_len, shape, tgt_axis, in_axis):
    """Fused bilinear-resize(in_len->new_len) + center-crop/pad(new_len->tgt_len)
    weight matrix of static `shape` (target index along tgt_axis, source index
    along in_axis). Pure 2-D jnp -> lands on the VPU when traced in-kernel.
    Rows/cols in the pad region are zero."""
    t = jax.lax.broadcasted_iota(jnp.int32, shape, tgt_axis)   # target index
    j = jax.lax.broadcasted_iota(jnp.int32, shape, in_axis)    # source index
    r = t + crop                                               # index in resized image
    valid = (r >= 0) & (r < new_len) & (t < tgt_len)
    r_c = jnp.clip(r, 0, new_len - 1)
    # half-pixel centers (align_corners=False)
    src = (r_c.astype(jnp.float32) + 0.5) * jnp.float32(in_len) / new_len.astype(jnp.float32) - 0.5
    src = jnp.clip(src, 0.0, jnp.float32(in_len - 1))
    lo = jnp.floor(src).astype(jnp.int32)
    hi = jnp.minimum(lo + 1, in_len - 1)
    frac = src - lo.astype(jnp.float32)
    w = jnp.where(j == lo, 1.0 - frac, 0.0) + jnp.where(j == hi, frac, 0.0)
    return jnp.where(valid, w, 0.0)


def _valid_vec(new_len, crop, tgt_len, shape, tgt_axis):
    """f32 validity mask (1 = from image, 0 = fill region) of static 2-D `shape`
    that is 1-wide along the non-target axis."""
    t = jax.lax.broadcasted_iota(jnp.int32, shape, tgt_axis)
    r = t + crop
    return jnp.where((r >= 0) & (r < new_len) & (t < tgt_len), 1.0, 0.0)


# ---------------------------------------------------------------------------
# Pallas kernel: one channel per grid step, weights built in-kernel
# ---------------------------------------------------------------------------
def _make_kernel(H, W, Th, Tw, Thp, Twp, fill):
    has_fill = float(fill) != 0.0

    def kernel(geom_ref, x_ref, out_ref):
        nh, nw = geom_ref[0], geom_ref[1]
        ch, cw = geom_ref[2], geom_ref[3]

        # Fused resize+crop/pad weights, built from SMEM scalars (VPU work,
        # hidden under MXU/DMA; no weight HBM traffic).
        wh = _weight_block(nh, ch, H, Th, (Thp, H), tgt_axis=0, in_axis=1)    # (Thp, H)
        wwT = _weight_block(nw, cw, W, Tw, (W, Twp), tgt_axis=1, in_axis=0)   # (W, Twp)

        x = x_ref[0]                                                           # (H, W) f32
        t1 = jnp.dot(x, wwT, preferred_element_type=jnp.float32)              # (H, Twp)
        o = jnp.dot(wh, t1, preferred_element_type=jnp.float32)               # (Thp, Twp)

        if has_fill:
            vh = _valid_vec(nh, ch, Th, (Thp, 1), 0)                          # (Thp, 1)
            vw = _valid_vec(nw, cw, Tw, (1, Twp), 1)                          # (1, Twp)
            mask = vh * vw                                                    # (Thp, Twp)
            o = o * mask + (1.0 - mask) * jnp.float32(fill)

        out_ref[0] = o

    return kernel


# ---------------------------------------------------------------------------
# Wrapper
# ---------------------------------------------------------------------------
@functools.partial(jax.jit,
                   static_argnames=("target_size", "scale_range", "fill",
                                    "random_crop"))
def scale_jitter_pallas(img, key, target_size, scale_range, fill=0,
                        random_crop=False):
    """img: (C, H, W) float32. Returns (C, Th, Tw) float32."""
    assert not random_crop, "only the module-default center-crop path is implemented"
    C, H, W = img.shape
    Th, Tw = target_size
    Thp = _round_up(Th, 8)        # sublane-aligned output rows
    Twp = _round_up(Tw, 128)      # lane-dense output columns (unmasked vst)

    geom = _sample_geometry(key, (H, W), target_size, scale_range)

    # Per-step VMEM estimate: double-buffered image & output blocks + in-kernel
    # weights + intermediate, with headroom; clamped to v7x's 64 MiB physical.
    est = 4 * (2 * H * W + 2 * Thp * Twp + Thp * H + W * Twp + H * Twp + 2 * Thp * Twp)
    vmem_limit = int(min(64 * 1024 * 1024, max(32 * 1024 * 1024, 2 * est)))

    out = pl.pallas_call(
        _make_kernel(H, W, Th, Tw, Thp, Twp, float(fill)),
        out_shape=jax.ShapeDtypeStruct((C, Thp, Twp), jnp.float32),
        grid_spec=pltpu.PrefetchScalarGridSpec(
            num_scalar_prefetch=1,
            grid=(C,),
            in_specs=[pl.BlockSpec((1, H, W), lambda c, geom: (c, 0, 0))],
            out_specs=pl.BlockSpec((1, Thp, Twp), lambda c, geom: (c, 0, 0)),
        ),
        compiler_params=pltpu.CompilerParams(
            dimension_semantics=("parallel",),
            vmem_limit_bytes=vmem_limit),
    )(geom, img.astype(jnp.float32))

    if Thp == Th and Twp == Tw:
        return out
    # NOTE: this slice is one extra HBM pass over the output; consumers that can
    # accept the lane-dense (Thp, Twp) padded slab should take `out` directly.
    return out[:, :Th, :Tw]


# ---------------------------------------------------------------------------
# Pure-JAX reference (identical weight math, f32)
# ---------------------------------------------------------------------------
def _reference(img, key, target_size, scale_range, fill):
    C, H, W = img.shape
    Th, Tw = target_size
    geom = _sample_geometry(key, (H, W), target_size, scale_range)
    nh, nw, ch, cw = geom[0], geom[1], geom[2], geom[3]
    wh = _weight_block(nh, ch, H, Th, (Th, H), 0, 1)
    wwT = _weight_block(nw, cw, W, Tw, (W, Tw), 1, 0)
    out = jnp.einsum("th,chw->ctw", wh, img.astype(jnp.float32))
    out = jnp.einsum("ctw,wx->ctx", out, wwT)
    vh = _valid_vec(nh, ch, Th, (Th, 1), 0)
    vw = _valid_vec(nw, cw, Tw, (1, Tw), 1)
    mask = vh * vw
    return out * mask + (1.0 - mask) * jnp.float32(fill)


if __name__ == "__main__":
    key = jax.random.PRNGKey(0)
    k_img, k1, k2 = jax.random.split(key, 3)

    C, H, W = 3, 16, 16
    img = jax.random.uniform(k_img, (C, H, W), dtype=jnp.float32)

    # Case 1: default fill=0, scale range spanning crop & pad regimes.
    ts1, sr1 = (24, 20), (0.5, 1.5)
    out1 = jax.block_until_ready(scale_jitter_pallas(img, k1, ts1, sr1, fill=0))
    assert out1.shape == (C, 24, 20), out1.shape
    assert out1.dtype == jnp.float32
    ref1 = _reference(img, k1, ts1, sr1, 0.0)
    np.testing.assert_allclose(np.asarray(out1), np.asarray(ref1),
                               rtol=5e-2, atol=5e-2)

    # Case 2: strong downscale -> guaranteed symmetric pad, non-zero fill.
    ts2, sr2 = (24, 20), (0.3, 0.6)
    out2 = jax.block_until_ready(scale_jitter_pallas(img, k2, ts2, sr2, fill=3))
    assert out2.shape == (C, 24, 20), out2.shape
    ref2 = _reference(img, k2, ts2, sr2, 3.0)
    np.testing.assert_allclose(np.asarray(out2), np.asarray(ref2),
                               rtol=5e-2, atol=5e-2)

    print("KERNEL_OK")
</pallas_src>

<mosaic_0001>
module attributes {stable_mosaic.version = 11 : i64} {
  func.func @kernel(%arg0: i32, %arg1: memref<4xi32, #tpu.memory_space<smem>>, %arg2: memref<1x16x16xf32, #tpu.memory_space<vmem>>, %arg3: memref<1x24x128xf32, #tpu.memory_space<vmem>>) attributes {dimension_semantics = [#tpu.dimension_semantics<parallel>], iteration_bounds = array<i64: 3>, scalar_prefetch = 1 : i64, scratch_operands = 0 : i64, tpu.core_type = #tpu.core_type<tc>, window_params = [{transform_indices = @transform_0, window_bounds = array<i64: 1, 16, 16>}, {transform_indices = @transform_1, window_bounds = array<i64: 1, 24, 128>}]} {
    %c0 = arith.constant 0 : index
    %0 = memref.load %arg1[%c0] : memref<4xi32, #tpu.memory_space<smem>>
    %c1 = arith.constant 1 : index
    %1 = memref.load %arg1[%c1] : memref<4xi32, #tpu.memory_space<smem>>
    %c2 = arith.constant 2 : index
    %2 = memref.load %arg1[%c2] : memref<4xi32, #tpu.memory_space<smem>>
    %c3 = arith.constant 3 : index
    %3 = memref.load %arg1[%c3] : memref<4xi32, #tpu.memory_space<smem>>
    %4 = tpu.iota {dimensions = array<i32: 0>} : vector<24x16xi32>
    %5 = tpu.iota {dimensions = array<i32: 1>} : vector<24x16xi32>
    %6 = vector.broadcast %2 : i32 to vector<24x16xi32>
    %7 = arith.addi %4, %6 : vector<24x16xi32>
    %c0_i32 = arith.constant 0 : i32
    %8 = vector.broadcast %c0_i32 : i32 to vector<24x16xi32>
    %9 = arith.cmpi sge, %7, %8 : vector<24x16xi32>
    %10 = vector.broadcast %0 : i32 to vector<24x16xi32>
    %11 = arith.cmpi slt, %7, %10 : vector<24x16xi32>
    %12 = arith.andi %9, %11 : vector<24x16xi1>
    %c24_i32 = arith.constant 24 : i32
    %13 = vector.broadcast %c24_i32 : i32 to vector<24x16xi32>
    %14 = arith.cmpi slt, %4, %13 : vector<24x16xi32>
    %15 = arith.andi %12, %14 : vector<24x16xi1>
    %c1_i32 = arith.constant 1 : i32
    %16 = arith.subi %0, %c1_i32 : i32
    %c0_i32_0 = arith.constant 0 : i32
    %17 = vector.broadcast %c0_i32_0 : i32 to vector<24x16xi32>
    %18 = arith.maxsi %17, %7 : vector<24x16xi32>
    %19 = vector.broadcast %16 : i32 to vector<24x16xi32>
    %20 = arith.minsi %19, %18 : vector<24x16xi32>
    %21 = arith.sitofp %20 : vector<24x16xi32> to vector<24x16xf32>
    %cst = arith.constant 5.000000e-01 : f32
    %22 = vector.broadcast %cst : f32 to vector<24x16xf32>
    %23 = arith.addf %21, %22 : vector<24x16xf32>
    %cst_1 = arith.constant 1.600000e+01 : f32
    %24 = vector.broadcast %cst_1 : f32 to vector<24x16xf32>
    %25 = arith.mulf %23, %24 : vector<24x16xf32>
    %26 = arith.sitofp %0 : i32 to f32
    %27 = vector.broadcast %26 : f32 to vector<24x16xf32>
    %28 = arith.divf %25, %27 : vector<24x16xf32>
    %cst_2 = arith.constant 5.000000e-01 : f32
    %29 = vector.broadcast %cst_2 : f32 to vector<24x16xf32>
    %30 = arith.subf %28, %29 : vector<24x16xf32>
    %cst_3 = arith.constant 0.000000e+00 : f32
    %cst_4 = arith.constant 1.500000e+01 : f32
    %31 = vector.broadcast %cst_3 : f32 to vector<24x16xf32>
    %32 = arith.maximumf %31, %30 : vector<24x16xf32>
    %33 = vector.broadcast %cst_4 : f32 to vector<24x16xf32>
    %34 = arith.minimumf %33, %32 : vector<24x16xf32>
    %35 = math.floor %34 : vector<24x16xf32>
    %36 = arith.fptosi %35 : vector<24x16xf32> to vector<24x16xi32>
    %c1_i32_5 = arith.constant 1 : i32
    %37 = vector.broadcast %c1_i32_5 : i32 to vector<24x16xi32>
    %38 = arith.addi %36, %37 : vector<24x16xi32>
    %c15_i32 = arith.constant 15 : i32
    %39 = vector.broadcast %c15_i32 : i32 to vector<24x16xi32>
    %40 = arith.minsi %38, %39 : vector<24x16xi32>
    %41 = arith.sitofp %36 : vector<24x16xi32> to vector<24x16xf32>
    %42 = arith.subf %34, %41 : vector<24x16xf32>
    %43 = arith.cmpi eq, %5, %36 : vector<24x16xi32>
    %cst_6 = arith.constant 1.000000e+00 : f32
    %44 = vector.broadcast %cst_6 : f32 to vector<24x16xf32>
    %45 = arith.subf %44, %42 : vector<24x16xf32>
    %cst_7 = arith.constant 0.000000e+00 : f32
    %46 = vector.broadcast %cst_7 : f32 to vector<24x16xf32>
    %47 = arith.select %43, %45, %46 : vector<24x16xi1>, vector<24x16xf32>
    %48 = arith.cmpi eq, %5, %40 : vector<24x16xi32>
    %cst_8 = arith.constant 0.000000e+00 : f32
    %49 = vector.broadcast %cst_8 : f32 to vector<24x16xf32>
    %50 = arith.select %48, %42, %49 : vector<24x16xi1>, vector<24x16xf32>
    %51 = arith.addf %47, %50 : vector<24x16xf32>
    %cst_9 = arith.constant 0.000000e+00 : f32
    %52 = vector.broadcast %cst_9 : f32 to vector<24x16xf32>
    %53 = arith.select %15, %51, %52 : vector<24x16xi1>, vector<24x16xf32>
    %54 = tpu.iota {dimensions = array<i32: 1>} : vector<16x128xi32>
    %55 = tpu.iota {dimensions = array<i32: 0>} : vector<16x128xi32>
    %56 = vector.broadcast %3 : i32 to vector<16x128xi32>
    %57 = arith.addi %54, %56 : vector<16x128xi32>
    %c0_i32_10 = arith.constant 0 : i32
    %58 = vector.broadcast %c0_i32_10 : i32 to vector<16x128xi32>
    %59 = arith.cmpi sge, %57, %58 : vector<16x128xi32>
    %60 = vector.broadcast %1 : i32 to vector<16x128xi32>
    %61 = arith.cmpi slt, %57, %60 : vector<16x128xi32>
    %62 = arith.andi %59, %61 : vector<16x128xi1>
    %c20_i32 = arith.constant 20 : i32
    %63 = vector.broadcast %c20_i32 : i32 to vector<16x128xi32>
    %64 = arith.cmpi slt, %54, %63 : vector<16x128xi32>
    %65 = arith.andi %62, %64 : vector<16x128xi1>
    %c1_i32_11 = arith.constant 1 : i32
    %66 = arith.subi %1, %c1_i32_11 : i32
    %c0_i32_12 = arith.constant 0 : i32
    %67 = vector.broadcast %c0_i32_12 : i32 to vector<16x128xi32>
    %68 = arith.maxsi %67, %57 : vector<16x128xi32>
    %69 = vector.broadcast %66 : i32 to vector<16x128xi32>
    %70 = arith.minsi %69, %68 : vector<16x128xi32>
    %71 = arith.sitofp %70 : vector<16x128xi32> to vector<16x128xf32>
    %cst_13 = arith.constant 5.000000e-01 : f32
    %72 = vector.broadcast %cst_13 : f32 to vector<16x128xf32>
    %73 = arith.addf %71, %72 : vector<16x128xf32>
    %cst_14 = arith.constant 1.600000e+01 : f32
    %74 = vector.broadcast %cst_14 : f32 to vector<16x128xf32>
    %75 = arith.mulf %73, %74 : vector<16x128xf32>
    %76 = arith.sitofp %1 : i32 to f32
    %77 = vector.broadcast %76 : f32 to vector<16x128xf32>
    %78 = arith.divf %75, %77 : vector<16x128xf32>
    %cst_15 = arith.constant 5.000000e-01 : f32
    %79 = vector.broadcast %cst_15 : f32 to vector<16x128xf32>
    %80 = arith.subf %78, %79 : vector<16x128xf32>
    %cst_16 = arith.constant 0.000000e+00 : f32
    %cst_17 = arith.constant 1.500000e+01 : f32
    %81 = vector.broadcast %cst_16 : f32 to vector<16x128xf32>
    %82 = arith.maximumf %81, %80 : vector<16x128xf32>
    %83 = vector.broadcast %cst_17 : f32 to vector<16x128xf32>
    %84 = arith.minimumf %83, %82 : vector<16x128xf32>
    %85 = math.floor %84 : vector<16x128xf32>
    %86 = arith.fptosi %85 : vector<16x128xf32> to vector<16x128xi32>
    %c1_i32_18 = arith.constant 1 : i32
    %87 = vector.broadcast %c1_i32_18 : i32 to vector<16x128xi32>
    %88 = arith.addi %86, %87 : vector<16x128xi32>
    %c15_i32_19 = arith.constant 15 : i32
    %89 = vector.broadcast %c15_i32_19 : i32 to vector<16x128xi32>
    %90 = arith.minsi %88, %89 : vector<16x128xi32>
    %91 = arith.sitofp %86 : vector<16x128xi32> to vector<16x128xf32>
    %92 = arith.subf %84, %91 : vector<16x128xf32>
    %93 = arith.cmpi eq, %55, %86 : vector<16x128xi32>
    %cst_20 = arith.constant 1.000000e+00 : f32
    %94 = vector.broadcast %cst_20 : f32 to vector<16x128xf32>
    %95 = arith.subf %94, %92 : vector<16x128xf32>
    %cst_21 = arith.constant 0.000000e+00 : f32
    %96 = vector.broadcast %cst_21 : f32 to vector<16x128xf32>
    %97 = arith.select %93, %95, %96 : vector<16x128xi1>, vector<16x128xf32>
    %98 = arith.cmpi eq, %55, %90 : vector<16x128xi32>
    %cst_22 = arith.constant 0.000000e+00 : f32
    %99 = vector.broadcast %cst_22 : f32 to vector<16x128xf32>
    %100 = arith.select %98, %92, %99 : vector<16x128xi1>, vector<16x128xf32>
    %101 = arith.addf %97, %100 : vector<16x128xf32>
    %cst_23 = arith.constant 0.000000e+00 : f32
    %102 = vector.broadcast %cst_23 : f32 to vector<16x128xf32>
    %103 = arith.select %65, %101, %102 : vector<16x128xi1>, vector<16x128xf32>
    %c0_24 = arith.constant 0 : index
    %c0_25 = arith.constant 0 : index
    %c0_26 = arith.constant 0 : index
    %104 = vector.load %arg2[%c0_24, %c0_25, %c0_26] : memref<1x16x16xf32, #tpu.memory_space<vmem>>, vector<1x16x16xf32>
    %105 = vector.shape_cast %104 : vector<1x16x16xf32> to vector<16x16xf32>
    %cst_27 = arith.constant dense<0.000000e+00> : vector<16x128xf32>
    %106 = tpu.matmul %105, %103, %cst_27 {dimension_numbers = #tpu.dot_dimension_numbers<[1], [0], [0], [1], [0, 0, 1, 1], [], []>} : vector<16x16xf32>, vector<16x128xf32>, vector<16x128xf32> -> vector<16x128xf32>
    %cst_28 = arith.constant dense<0.000000e+00> : vector<24x128xf32>
    %107 = tpu.matmul %53, %106, %cst_28 {dimension_numbers = #tpu.dot_dimension_numbers<[1], [0], [0], [1], [0, 0, 1, 1], [], []>} : vector<24x16xf32>, vector<16x128xf32>, vector<24x128xf32> -> vector<24x128xf32>
    %c0_29 = arith.constant 0 : index
    %c0_30 = arith.constant 0 : index
    %c0_31 = arith.constant 0 : index
    %108 = vector.load %arg3[%c0_29, %c0_30, %c0_31] : memref<1x24x128xf32, #tpu.memory_space<vmem>>, vector<1x24x128xf32>
    %109 = vector.shape_cast %108 : vector<1x24x128xf32> to vector<24x128xf32>
    %110 = vector.shape_cast %107 : vector<24x128xf32> to vector<1x24x128xf32>
    tpu.vector_store %arg3[%c0_29, %c0_30, %c0_31], %110 {strides = array<i32>} : memref<1x24x128xf32, #tpu.memory_space<vmem>>, vector<1x24x128xf32>,
    return
  }
  func.func @transform_0(%arg0: i32, %arg1: memref<4xi32, #tpu.memory_space<smem>>) -> (i32, i32, i32) {
    %c0_i32 = arith.constant 0 : i32
    %c0_i32_0 = arith.constant 0 : i32
    %c0_i32_1 = arith.constant 0 : i32
    return %arg0, %c0_i32, %c0_i32_0 : i32, i32, i32
  }
  func.func @transform_1(%arg0: i32, %arg1: memref<4xi32, #tpu.memory_space<smem>>) -> (i32, i32, i32) {
    %c0_i32 = arith.constant 0 : i32
    %c0_i32_0 = arith.constant 0 : i32
    %c0_i32_1 = arith.constant 0 : i32
    return %arg0, %c0_i32, %c0_i32_0 : i32, i32, i32
  }
}

</mosaic_0001>

<bundles_post_ra>
// kernel: scale_jitter_pallas.1
= control target key start
LH: loop header
LB: loop body
LE: loop exit
PB: predicated region body
PF: predicated region fallthrough
CT: control target
= control target key end

     0   :  { %s918_s0 = inlined_call_operand.vmem [shape: s32[4], index: 0, kind: input, shape index: {}]   ;;  %s919_s1 = inlined_call_operand.vmem [shape: f32[3,16,16], index: 1, kind: input, shape index: {}]   ;;  %s920_s2 = inlined_call_operand.hbm [shape: f32[3,24,128], index: 2, kind: output, shape index: {}]  }
   0x1   :  { %s7_s11 = sshll.u32 %s918_s0, 4  ;;  %s8_s11 = int_to_ptr.vmem [resolvable:$true] %s7_s11 }
   0x2   :  { %s653_s12 = scalar_lea.vmem %s8_s11, 16  ;;  %p658_p1 = scmp.lt.s32.totalorder %s8_s11, %s8_s11 }
   0x3   :  { %p654_p0 = scmp.ne.s32.totalorder %s8_s11, %s653_s12  ;;  %p659_p2 = scmp.lt.s32.totalorder %s653_s12, %s653_s12 }
   0x5   :  { %p660_p3 = por %p659_p2, %p658_p1 }
   0x7   :  { %p661_p4 = pnand %p660_p3, %p654_p0 }
   0x9   :  { %664 = shalt.err (!%p661_p4)  }
   0xa   :  { %s731_s13 = smov [#allocation3]  }
   0xb   :  { %10 = dma.vmem_to_smem %s8_s11, 16, %s731_s13, [#allocation2] }
   0xc   :  { %709 = dma.done.wait [#allocation2], 16 }
   0xd   :  { %710 = vsyncadd [#allocation2], 4294967280 }
   0xe   :  { %12 = sfence }
   0xf   :  { %13 = vsyncpa [#allocation5], 0 }
  0x10   :  { %15 = vsyncpa [#allocation5 + $0x1], 0  ;;  %s756_s14 = smov 0   ;;  %s758_s15 = smov 0  }
  0x11   :  { %s760_s0 = smov 0   ;;  %s762_s16 = smov 0  }
  0x12 LB: > { %s777_s17 = sadd.s32 4294967295, %s729_s16   ;;  %s528_s18 = sadd.s32 4294967294, %s729_s16   ;;  %s729_s16 = sphi %s762_s16, %s928_s16   ;;  %s725_s0 = sphi %s760_s0, %s927_s0   ;;  %s721_s15 = sphi %s758_s15, %s926_s15   ;;  %s717_s14 = sphi %s756_s14, %s925_s14  }
  0x13   : > { %s781_s19 = sadd.s32 1, %s729_s16   ;;  %s54_s20 = sadd.s32 1, %s725_s0 }
  0x14   : > { %s51_s21 = ssub.s32 %s729_s16, %s781_s19  ;;  %p64_p5 = scmp.ne.s32.totalorder %s725_s0, %s721_s15 }
  0x15   : > { %p52_p6 = scmp.eq.s32.totalorder %s51_s21, 0  ;;  %p65_p7 = scmp.eq.s32.totalorder %s777_s17, 2 }
  0x16   : > { %p70_p8 = scmp.ne.s32.totalorder %s721_s15, %s717_s14  ;;  %p71_p9 = scmp.eq.s32.totalorder %s528_s18, 2 }
  0x17   : > { %s792_s22 = scalar_select %p52_p6, %s725_s0, %s54_s20  }
  0x18   : > { %p794_p10 = por %p65_p7, %p64_p5  ;;  %p798_p11 = por %p71_p9, %p70_p8 }
  0x19   : > { %p531_p12 = scmp.ge.s32.totalorder %s729_s16, 1  ;;  %p97_p13 = scmp.lt.s32.totalorder %s729_s16, 4 }
  0x1b   : > { %p98_p0 = pnand %p531_p12, %p97_p13 }
  0x1c   : > { %s804_s25 = sld [smem:[#allocation3 + $0x1]] (!%p98_p0)  ;;  %s536_s26 = sld [smem:[#allocation3 + $0x3]] (!%p98_p0)  ;;  %v126_v0 = vlaneseq (!%p98_p0)  ;;  %vm278_vm0 = vcmask (!%p98_p0), 130048   ;;  %v732_v36 = vmov (!%p98_p0), 0.0|0.0   ;;  %vm733_vm14 = vmmov (!%p98_p0), 0  }
  0x1d   : > { %101 = sbr.rel (%p98_p0) target bundleno = 526 (0x20e), region = 24  ;;  %p117_p1 = scmp.lt.s32.totalorder (!%p98_p0), %s777_s17, 2  ;;  %592 = vmatprep.subr.bf16.mxu1 (!%p98_p0), %v732_v36  ;;  %v734_v37 = vmov (!%p98_p0), 0.0  }
  0x1e   : > { %v807_v1 = vand.u32 (!%p98_p0), 127, %v126_v0  ;;  %v127_v18 = vshrl.u32 (!%p98_p0), %v126_v0, 7  ;;  %577 = vmatprep.mubr.msk.f32.mxu1 (!%p98_p0), %vm733_vm14, %v734_v37  ;;  %s535_s6 = sld [smem:[#allocation3 + $0x2]] (!%p98_p0)  ;;  %s828_s7 = sld [smem:[#allocation3]] (!%p98_p0) }
  0x1f   : > { %s114_s10 = sand.u32 (!%p98_p0), 1, %s721_s15   ;;  %s603_s12 = smul.u32 (!%p98_p0), 384, %s777_s17 }
  0x20   : > { %v128_v22 = vadd.s32 (!%p98_p0), 8, %v127_v18  ;;  %vm238_vm6 = vcmp.lt.s32.totalorder (!%p98_p0), %v807_v1, 20  ;;  %v129_v41 = vadd.s32 (!%p98_p0), 16, %v127_v18  ;;  %s594_s11 = smul.u32 (!%p98_p0), 24, %s114_s10 }
  0x22   : > { %v232_v2 = vstv (!%p98_p0), %s536_s26  ;;  %s541_s29 = sadd.s32 (!%p98_p0), 4294967295, %s804_s25  ;;  %s249_s30 = scvt.s32.f32 (!%p98_p0), %s804_s25  ;;  %v235_v19 = vstv (!%p98_p0), %s804_s25 }
  0x23   : > { %v233_v3 = vadd.s32 (!%p98_p0), %v232_v2, %v807_v1  ;;  %v243_v4 = vstv (!%p98_p0), %s541_s29  ;;  %s116_s13 = scalar_lea.vmem (!%p98_p0), [#allocation4], %s594_s11  ;;  %s875_s25 = scalar_lea.hbm (!%p98_p0), %s920_s2, %s603_s12 }
  0x24   : > { %s118_s27 = scalar_select %p117_p1, %s777_s17, 2  ;;  %v250_v5 = vstv %s249_s30  ;;  %v132_v38 = vstv %s535_s6 }
  0x25   : > { %vm241_vm1 = vcmp.gt.s32.totalorder %v233_v3, 0  ;;  %649 = vrcp.f32 %v250_v5  ;;  %vm234_vm3 = vcmp.ge.s32.totalorder %v233_v3, 0  ;;  %vm236_vm4 = vcmp.lt.s32.totalorder %v233_v3, %v235_v19  ;;  %s537_s8 = sadd.s32 4294967295, %s828_s7  ;;  %s175_s9 = scvt.s32.f32 %s828_s7 }
  0x26   : > { %s553_s28 = sshll.u32 %s118_s27, 4  ;;  %v242_v7 = vsel %vm241_vm1, %v233_v3, 0  ;;  %vm237_vm5 = vmand %vm234_vm3, %vm236_vm4  ;;  %v830_v39 = vadd.s32 %v132_v38, %v128_v22  ;;  %v832_v40 = vadd.s32 %v132_v38, %v127_v18  ;;  %v837_v42 = vadd.s32 %v132_v38, %v129_v41  ;;  %s466_s18 = sshll.u32 %s116_s13, 4  ;;  %s870_s18 = int_to_ptr.vmem [resolvable:$true] %s466_s18 }
  0x27   : > { %s816_s5 = scalar_lea.vmem %s919_s1, %s553_s28  ;;  %vm244_vm2 = vcmp.lt.s32.totalorder %v243_v4, %v242_v7  ;;  %vm239_vm12 = vmand %vm237_vm5, %vm238_vm6  ;;  %v159_v44 = vstv %s537_s8  ;;  %v176_v46 = vstv %s175_s9  ;;  %s877_s17 = scalar_lea.sflag [#allocation5], %s114_s10 }
  0x28   : > { %v276_v6 = vld [vmem:[%s816_s5] sm:$0xff]  ;;  %v245_v8 = vsel %vm244_vm2, %v243_v4, %v242_v7  ;;  %vm584_vm13 = vmpackc.low %vm239_vm12, %vm239_vm12  ;;  %v277_v35 = vld [vmem:[%s816_s5 + $0x8] sm:$0xff]  ;;  %vm155_vm15 = vcmp.gt.s32.totalorder %v830_v39, 0  ;;  %vm153_vm1 = vcmp.gt.s32.totalorder %v832_v40, 0  ;;  %vm157_vm2 = vcmp.gt.s32.totalorder %v837_v42, 0  ;;  %s665_s26 = scalar_lea.vmem %s870_s18, 384 }
  0x29   : > { %567 = vmatprep.mubr.msk.f32.mxu0 %vm278_vm0, %v276_v6  ;;  %v246_v9 = vcvt.s32.f32 %v245_v8  ;;  %v156_v43 = vsel %vm155_vm15, %v830_v39, 0  ;;  %v154_v45 = vsel %vm153_vm1, %v832_v40, 0  ;;  %v158_v47 = vsel %vm157_vm2, %v837_v42, 0  ;;  %p666_p2 = scmp.ne.s32.totalorder %s870_s18, %s665_s26  ;;  %s735_s27 = smov [#allocation4]  }
  0x2a   : > { %vm162_vm3 = vcmp.lt.s32.totalorder %v159_v44, %v156_v43  ;;  %vm160_vm4 = vcmp.lt.s32.totalorder %v159_v44, %v154_v45  ;;  %651 = vrcp.f32 %v176_v46  ;;  %vm164_vm5 = vcmp.lt.s32.totalorder %v159_v44, %v158_v47  ;;  %s669_s28 = sshll.u32 %s735_s27, 4  ;;  %s670_s28 = int_to_ptr.vmem [resolvable:$false] %s669_s28 }
  0x2b   : > { %v247_v10 = vadd.f32 0.5, %v246_v9  ;;  %v163_v48 = vsel %vm162_vm3, %v159_v44, %v156_v43  ;;  %v161_v49 = vsel %vm160_vm4, %v159_v44, %v154_v45  ;;  %v165_v52 = vsel %vm164_vm5, %v159_v44, %v158_v47  ;;  %p667_p3 = pnand %p666_p2, %p794_p10  ;;  %s671_s29 = scalar_lea.vmem %s670_s28, 768 }
  0x2c   : > { %v167_v50 = vcvt.s32.f32 %v163_v48  ;;  %v166_v51 = vcvt.s32.f32 %v161_v49  ;;  %v168_v55 = vcvt.s32.f32 %v165_v52  ;;  %vm136_vm1 = vcmp.ge.s32.totalorder %v832_v40, 0  ;;  %p672_p5 = scmp.lt.s32.totalorder %s870_s18, %s670_s28  ;;  %p673_p6 = scmp.lt.s32.totalorder %s671_s29, %s665_s26 }
  0x2d   : > { %v248_v11 = vmul.f32 16.0, %v247_v10  ;;  %p668_p4 = pneg %p667_p3 }
  0x2e   : > { %v170_v53 = vadd.f32 0.5, %v167_v50  ;;  %v169_v54 = vadd.f32 0.5, %v166_v51  ;;  %v171_v59 = vadd.f32 0.5, %v168_v55  ;;  %p674_p7 = por %p673_p6, %p672_p5 }
  0x2f   : > { %v650_v12 = vpop.eup %649 }
  0x30   : > { %v252_v13 = vmul.f32 %v650_v12, %v248_v11  ;;  %v173_v56 = vmul.f32 16.0, %v170_v53  ;;  %v172_v58 = vmul.f32 16.0, %v169_v54  ;;  %v174_v62 = vmul.f32 16.0, %v171_v59  ;;  %p675_p8 = pnand %p674_p7, %p668_p4 }
  0x32   : > { %v542_v14 = vadd.f32 -0.5, %v252_v13 }
  0x34   : > { %v254_v15 = vmax.f32 %v542_v14, 0.0  ;;  %v652_v57 = vpop.eup %651 }
  0x35   : > { %v179_v60 = vmul.f32 %v652_v57, %v173_v56  ;;  %v178_v61 = vmul.f32 %v652_v57, %v172_v58  ;;  %v180_v2 = vmul.f32 %v652_v57, %v174_v62 }
  0x36   : > { %v255_v16 = vmin.f32 %v254_v15, 15.0 }
  0x37   : > { %v539_v63 = vadd.f32 -0.5, %v179_v60  ;;  %v538_v0 = vadd.f32 -0.5, %v178_v61  ;;  %v540_v5 = vadd.f32 -0.5, %v180_v2 }
  0x38   : > { %v256_v17 = vfloor.f32 %v255_v16 }
  0x39   : > { %v185_v3 = vmax.f32 %v539_v63, 0.0  ;;  %v184_v4 = vmax.f32 %v538_v0, 0.0  ;;  %v186_v8 = vmax.f32 %v540_v5, 0.0 }
  0x3a   : > { %v601_v20 = vtrunc.f32 %v256_v17 }
  0x3b   : > { %v188_v6 = vmin.f32 %v185_v3, 15.0  ;;  %v187_v7 = vmin.f32 %v184_v4, 15.0  ;;  %v189_v11 = vmin.f32 %v186_v8, 15.0 }
  0x3c   : > { %v602_v21 = vcvt.f32.s32 %v601_v20 }
  0x3d   : > { %v191_v9 = vfloor.f32 %v188_v6  ;;  %v190_v10 = vfloor.f32 %v187_v7  ;;  %v192_v14 = vfloor.f32 %v189_v11 }
  0x3e   : > { %v258_v23 = vadd.s32 1, %v602_v21  ;;  %v261_v24 = vcvt.s32.f32 %v602_v21  ;;  %vm263_vm8 = vcmp.eq.s32.totalorder %v127_v18, %v602_v21  ;;  %vm264_vm9 = vcmp.eq.s32.totalorder %v128_v22, %v602_v21 }
  0x3f   : > { %v597_v12 = vtrunc.f32 %v191_v9  ;;  %v595_v13 = vtrunc.f32 %v190_v10  ;;  %v599_v17 = vtrunc.f32 %v192_v14 }
  0x40   : > { %vm259_vm7 = vcmp.lt.s32.totalorder %v258_v23, 15  ;;  %v262_v25 = vsub.f32 %v255_v16, %v261_v24 }
  0x41   : > { %v260_v26 = vsel %vm259_vm7, %v258_v23, 15  ;;  %v598_v15 = vcvt.f32.s32 %v597_v12  ;;  %v596_v16 = vcvt.f32.s32 %v595_v13  ;;  %v600_v21 = vcvt.f32.s32 %v599_v17 }
  0x42   : > { %v265_v27 = vsub.f32 1.0, %v262_v25  ;;  %vm268_vm10 = vcmp.eq.s32.totalorder %v127_v18, %v260_v26  ;;  %vm269_vm11 = vcmp.eq.s32.totalorder %v128_v22, %v260_v26 }
  0x43   : > { %v270_v28 = vsel %vm268_vm10, %v262_v25, 0.0  ;;  %v271_v29 = vsel %vm269_vm11, %v262_v25, 0.0  ;;  %v197_v18 = vadd.s32 1, %v598_v15  ;;  %v206_v19 = vcvt.s32.f32 %v598_v15 }
  0x44   : > { %v266_v30 = vsel %vm263_vm8, %v265_v27, 0.0  ;;  %v267_v31 = vsel %vm264_vm9, %v265_v27, 0.0  ;;  %v196_v20 = vadd.s32 1, %v596_v16  ;;  %v205_v22 = vcvt.s32.f32 %v596_v16 }
  0x45   : > { %v272_v32 = vadd.f32 %v270_v28, %v266_v30  ;;  %v273_v33 = vadd.f32 %v271_v29, %v267_v31  ;;  %vm201_vm6 = vcmp.lt.s32.totalorder %v197_v18, 15  ;;  %v209_v23 = vsub.f32 %v188_v6, %v206_v19 }
  0x46   : > { %vm199_vm7 = vcmp.lt.s32.totalorder %v196_v20, 15  ;;  %v198_v24 = vadd.s32 1, %v600_v21  ;;  %v208_v25 = vsub.f32 %v187_v7, %v205_v22  ;;  %v207_v26 = vcvt.s32.f32 %v600_v21 }
  0x47   : > { %v583_v34 = vpack.c.bf16 %v273_v33, %v272_v32  ;;  %v202_v27 = vsel %vm201_vm6, %v197_v18, 15  ;;  %v200_v28 = vsel %vm199_vm7, %v196_v20, 15  ;;  %v215_v29 = vsub.f32 1.0, %v209_v23 }
  0x48   : > { %vm203_vm8 = vcmp.lt.s32.totalorder %v198_v24, 15  ;;  %vm212_vm9 = vcmp.eq.s32.totalorder %v807_v1, %v598_v15  ;;  %vm221_vm10 = vcmp.eq.s32.totalorder %v807_v1, %v202_v27  ;;  %v214_v30 = vsub.f32 1.0, %v208_v25 }
  0x49   : > { %585 = vmatprep.subr.msk.bf16.mxu0 %vm584_vm13, %v583_v34  ;;  %v210_v31 = vsub.f32 %v189_v11, %v207_v26  ;;  %v139_v32 = vstv %s828_s7  ;;  %vm211_vm11 = vcmp.eq.s32.totalorder %v807_v1, %v596_v16  ;;  %vm220_vm12 = vcmp.eq.s32.totalorder %v807_v1, %v200_v28 }
  0x4a   : > { %588 = vmatpush3.bf16.msk.msra.mxu0 %vm584_vm13, %v583_v34  ;;  %v204_v33 = vsel %vm203_vm8, %v198_v24, 15  ;;  %vm137_vm13 = vcmp.ge.s32.totalorder %v830_v39, 0  ;;  %v218_v34 = vsel %vm212_vm9, %v215_v29, 0.0  ;;  %vm141_vm15 = vcmp.lt.s32.totalorder %v830_v39, %v139_v32 }
  0x4b   : > { %589 = vmatprep.subr.bf16.mxu0 %v732_v36  ;;  %v217_v36 = vsel %vm211_vm11, %v214_v30, 0.0  ;;  %v223_v38 = vsel %vm220_vm12, %v208_v25, 0.0  ;;  %v216_v41 = vsub.f32 1.0, %v210_v31  ;;  %vm140_vm2 = vcmp.lt.s32.totalorder %v832_v40, %v139_v32  ;;  %vm855_vm5 = vmand %vm137_vm13, %vm141_vm15 }
  0x4c   : > { %vm213_vm3 = vcmp.eq.s32.totalorder %v807_v1, %v600_v21  ;;  %vm222_vm4 = vcmp.eq.s32.totalorder %v807_v1, %v204_v33  ;;  %v226_v46 = vadd.f32 %v223_v38, %v217_v36  ;;  %vm143_vm6 = vmand %vm136_vm1, %vm140_vm2  ;;  %vm138_vm7 = vcmp.ge.s32.totalorder %v837_v42, 0 }
  0x4d   : > { %568 = vmatmul.mubr.msk.f32.vlgmr.msra.gmra.mrb[0].mxu0 %vm278_vm0, %v277_v35  ;;  %v224_v35 = vsel %vm221_vm10, %v209_v23, 0.0  ;;  %v219_v39 = vsel %vm213_vm3, %v216_v41, 0.0  ;;  %v225_v48 = vsel %vm222_vm4, %v210_v31, 0.0  ;;  %vm142_vm8 = vcmp.lt.s32.totalorder %v837_v42, %v139_v32 }
  0x4e   : > { %574 = vmatprep.mubr.msk.f32.mxu0 %vm733_vm14, %v734_v37  ;;  %v227_v45 = vadd.f32 %v224_v35, %v218_v34  ;;  %v229_v40 = vsel %vm143_vm6, %v226_v46, 0.0  ;;  %v228_v50 = vadd.f32 %v225_v48, %v219_v39  ;;  %vm145_vm9 = vmand %vm138_vm7, %vm142_vm8 }
  0x50   : > { %v230_v1 = vsel %vm855_vm5, %v227_v45, 0.0  ;;  %v231_v51 = vsel %vm145_vm9, %v228_v50, 0.0 }
 0x120   : > { %v569_v43 = vpop.f32.mrb[0].mxu0 }
 0x121   : > { %v351_v47 = vpop.f32.mrb[1].mxu0 }
 0x122   : > { %v590_v49 = vpack.c.bf16 %v569_v43, %v351_v47 }
 0x124   : > { %591 = vmatpush3.bf16.msra.mxu0 %v590_v49  ;;  %593 = vmatpush3.bf16.msra.mxu1 %v590_v49 }
 0x127   : > { %578 = vmatmul.mubr.msk.f32.vlgmr.msra.gmra.mrb[0].mxu1 %vm278_vm0, %v230_v1  ;;  %575 = vmatmul.mubr.msk.f32.vlgmr.msra.gmra.mrb[2].mxu0 %vm278_vm0, %v229_v40 }
 0x128   : > { %580 = vmatprep.mubr.msk.f32.mxu1 %vm733_vm14, %v734_v37 }
 0x12b   : > { %581 = vmatmul.mubr.msk.f32.gmra.mrb[2].mxu1 %vm278_vm0, %v231_v51 }
 0x1fa   : > { %v440_v42 = vpop.f32.mrb[0].mxu1  ;;  %v435_v52 = vpop.f32.mrb[2].mxu0 }
 0x1fb   : > { %450 = vst [vmem:[%s116_s13 + $0x8] sm:$0xff] %v440_v42  ;;  %v579_v53 = vpop.f32.mrb[1].mxu1  ;;  %449 = vst [vmem:[%s116_s13] sm:$0xff] %v435_v52  ;;  %v576_v54 = vpop.f32.mrb[3].mxu0 }
 0x1fe   : > { %v445_v37 = vpop.f32.mrb[2].mxu1 }
 0x1ff   : > { %451 = vst [vmem:[%s116_s13 + $0x10] sm:$0xff] %v445_v37  ;;  %v582_v55 = vpop.f32.mrb[3].mxu1 }
 0x200   : > { %678 = shalt.err (!%p675_p8)
}
 0x201   : > { %s679_s30 = scalar_lea.hbm %s875_s25, 384  ;;  %s683_s5 = scalar_lea.hbm %s920_s2, 1152 }
 0x202   : > { %p680_p9 = scmp.ne.s32.totalorder %s875_s25, %s679_s30  ;;  %p684_p0 = scmp.lt.u32.totalorder %s875_s25, %s920_s2 }
 0x203   : > { %p685_p1 = scmp.lt.u32.totalorder %s683_s5, %s679_s30  ;;  %p687_p3 = scmp.lt.u32.totalorder %s679_s30, %s875_s25 }
 0x204   : > { %p681_p12 = pnand %p680_p9, %p794_p10 }
 0x205   : > { %p686_p2 = por %p685_p1, %p684_p0 }
 0x206   : > { %p682_p13 = pneg %p681_p12 }
 0x207   : > { %p688_p4 = por %p687_p3, %p686_p2 }
 0x209   : > { %p689_p5 = pnand %p688_p4, %p682_p13 }
 0x20b   : > { %692 = shalt.err (!%p689_p5)
}
 0x20c   : > { %s736_s8 = smov 128   ;;  %s737_s9 = smov 8  }
 0x20d   : > { %604 = dma.vmem_to_hbm [thread:$0]  (%p794_p10), %s870_s18, 384, %s875_s25, %s877_s17, %s736_s8, %s736_s8, %s737_s9  }
 0x20e PF: > { %p610_p6 = scmp.ge.s32.totalorder %s729_s16, 2  ;;  %s481_s10 = sand.u32 1, %s717_s14  }
 0x20f   : > { %s482_s11 = scalar_lea.sflag [#allocation5], %s481_s10 }
 0x210   : > { %p607_p7 = pnand %p610_p6, %p798_p11 }
 0x212   : > { %712 = dma.done.wait (!%p607_p7), %s482_s11, 384  }
 0x213   : > { %714 = vsyncadd (!%p607_p7), %s482_s11, 4294966912  ;;  %p18_p8 = scmp.ge.s32.totalorder %s781_s19, 5   ;;  %s925_s14 = smov %s721_s15 }
 0x214   : > { %s926_s15 = smov %s725_s0  ;;  %s927_s0 = smov %s792_s22 }
 0x215   : > { %s928_s16 = smov %s781_s19  ;;  %20 = sbr.rel (!%p18_p8) target bundleno = 18 (0x12), region = 59 }
 0x21c   :  { %487 = vsyncpa [#allocation5], 1 }
 0x21d   :  { %489 = vsyncpa [#allocation5 + $0x1], 1 }

</bundles_post_ra>
